<compile_context>
chip_gen: v7x
topology: tpu7x:2x2x1
jax: 0.10.0
libtpu: 0.0.40
codegen_flags: <defaults>
</compile_context>

<pallas_src>
import functools

import jax
import jax.numpy as jnp
from jax.experimental import pallas as pl


# ----------------------------------------------------------------------------
# Fused kernel
# ----------------------------------------------------------------------------
def _fused_forward_kernel(*refs, n_layers, latent_dim):
    # refs layout:
    #   [adj, x,
    #    (w_i, b_i, mask_i) for each hidden layer,
    #    w_head, b_mean, eps,
    #    z_out, mean_out, std_out]
    adj_ref, x_ref = refs[0], refs[1]
    idx = 2
    layer_refs = []
    for _ in range(n_layers):
        layer_refs.append((refs[idx], refs[idx + 1], refs[idx + 2]))
        idx += 3
    w_head_ref, b_mean_ref, eps_ref = refs[idx], refs[idx + 1], refs[idx + 2]
    z_ref, mean_ref, std_ref = refs[idx + 3], refs[idx + 4], refs[idx + 5]

    adj = adj_ref[...].astype(jnp.float32)
    h = x_ref[...].astype(jnp.float32)

    # ---- mixture branches: all relations batched along the lane axis -------
    for (w_ref, b_ref, m_ref) in layer_refs:
        # per-relation Linear (weights lane-stacked / block-diagonal)
        h = jnp.dot(h, w_ref[...], preferred_element_type=jnp.float32) + b_ref[...]
        # per-relation F.normalize(dim=1) * 1.8:
        #   ss[n, j] = sum over relation(j)'s lanes of h[n, :]^2   (mask matmul)
        ss = jnp.dot(h * h, m_ref[...], preferred_element_type=jnp.float32)
        h = h * (jax.lax.rsqrt(jnp.maximum(ss, 1e-24)) * 1.8)
        # GraphConv(weight=False): adj @ h, then tanh (dropout rate 0 -> id)
        h = jnp.tanh(jnp.dot(adj, h, preferred_element_type=jnp.float32))

    # ---- merged q_z_mean / q_z_std head -------------------------------------
    # one z_cat @ [W_mean | W_std] matmul, then split halves
    head = jnp.dot(h, w_head_ref[...], preferred_element_type=jnp.float32)
    hm = head[:, :latent_dim] + b_mean_ref[...]
    ss = jnp.sum(hm * hm, axis=1, keepdims=True)
    hm = hm * (jax.lax.rsqrt(jnp.maximum(ss, 1e-24)) * 1.8)
    hs = head[:, latent_dim:]

    mean = jnp.dot(adj, hm, preferred_element_type=jnp.float32)
    std = jnp.maximum(jnp.dot(adj, hs, preferred_element_type=jnp.float32), 0.0) + 1e-4

    mean_ref[...] = mean.astype(mean_ref.dtype)
    std_ref[...] = std.astype(std_ref.dtype)
    # reparameterize epilogue: z = eps * std + mean
    z_ref[...] = (eps_ref[...].astype(jnp.float32) * std + mean).astype(z_ref.dtype)


# ----------------------------------------------------------------------------
# pallas_call wrapper (gridless: the whole problem fits comfortably in VMEM)
# ----------------------------------------------------------------------------
def _full_spec(shape):
    return pl.BlockSpec(shape, lambda: (0,) * len(shape))


def mixture_of_ngcns_forward(fused, adj, x, eps):
    """fused = {'layers': [(w, b, mask), ...], 'w_head': ..., 'b_mean': ...}"""
    n = adj.shape[0]
    latent_dim = fused["b_mean"].shape[1]
    n_layers = len(fused["layers"])

    inputs = [adj, x]
    for (w, b, m) in fused["layers"]:
        inputs += [w, b, m]
    inputs += [fused["w_head"], fused["b_mean"], eps]

    in_specs = [_full_spec(a.shape) for a in inputs]
    out_shape = (
        jax.ShapeDtypeStruct((n, latent_dim), jnp.float32),  # z
        jax.ShapeDtypeStruct((n, latent_dim), jnp.float32),  # m_q_z
        jax.ShapeDtypeStruct((n, latent_dim), jnp.float32),  # std_q_z
    )
    out_specs = (
        _full_spec((n, latent_dim)),
        _full_spec((n, latent_dim)),
        _full_spec((n, latent_dim)),
    )

    # advisory cost estimate for the XLA scheduler
    flops = 0
    h_dim = x.shape[1]
    transcendentals = 0
    for (w, _, _) in fused["layers"]:
        f_out = w.shape[1]
        flops += 2 * n * h_dim * f_out      # linear
        flops += 2 * n * f_out * f_out      # sum-of-squares mask matmul
        flops += 2 * n * n * f_out          # adj @ h
        transcendentals += n * f_out        # tanh
        h_dim = f_out
    flops += 2 * n * h_dim * 2 * latent_dim  # merged head linear
    flops += 2 * 2 * n * n * latent_dim      # adj @ (mean | std)
    bytes_accessed = int(
        sum(int(a.size) * a.dtype.itemsize for a in inputs)
        + 3 * n * latent_dim * 4
    )

    kernel = functools.partial(
        _fused_forward_kernel, n_layers=n_layers, latent_dim=latent_dim
    )
    z, m_q_z, std_q_z = pl.pallas_call(
        kernel,
        out_shape=out_shape,
        in_specs=in_specs,
        out_specs=out_specs,
        cost_estimate=pl.CostEstimate(
            flops=int(flops),
            transcendentals=int(transcendentals),
            bytes_accessed=bytes_accessed,
        ),
    )(*inputs)
    return z, m_q_z, std_q_z


# ----------------------------------------------------------------------------
# Parameters (torch-like layout) + one-time fusion of weights
# ----------------------------------------------------------------------------
def init_params(key, in_feature, num_relation, latent_dim, layers):
    """Per-relation, per-layer params matching the shapes of the torch module
    (torch Linear weight is [out, in]; we store W^T = [in, out])."""
    params = {"gcns": []}
    dims = [in_feature] + layers
    for _ in range(num_relation):
        layer_params = []
        for i in range(len(dims) - 1):
            key, kw, kb = jax.random.split(key, 3)
            w = jax.random.normal(kw, (dims[i], dims[i + 1]), jnp.float32) * 0.1
            b = jax.random.normal(kb, (1, dims[i + 1]), jnp.float32) * 0.1
            layer_params.append((w, b))
        params["gcns"].append(layer_params)

    concat_dim = layers[-1] * num_relation
    key, kw, kb, ks = jax.random.split(key, 4)
    params["q_z_mean"] = (
        jax.random.normal(kw, (concat_dim, latent_dim), jnp.float32) * 0.1,
        jax.random.normal(kb, (1, latent_dim), jnp.float32) * 0.1,
    )
    params["q_z_std_w"] = (
        jax.random.normal(ks, (concat_dim, latent_dim), jnp.float32) * 0.1
    )
    return params


def prepare_fused_params(params, num_relation, in_feature, layers):
    """One-time (outside-kernel) stacking of per-relation weights so the fused
    kernel sees lane-batched / block-diagonal matrices."""
    dims = [in_feature] + layers
    fused_layers = []
    for i in range(len(layers)):
        f_in, f_out = dims[i], dims[i + 1]
        ws = [params["gcns"][r][i][0] for r in range(num_relation)]
        bs = [params["gcns"][r][i][1] for r in range(num_relation)]
        if i == 0:
            w = jnp.concatenate(ws, axis=1)                       # [f_in, R*f_out]
        else:
            w = jnp.zeros((num_relation * f_in, num_relation * f_out), jnp.float32)
            for r in range(num_relation):
                w = w.at[r * f_in:(r + 1) * f_in,
                         r * f_out:(r + 1) * f_out].set(ws[r])    # block-diag
        b = jnp.concatenate(bs, axis=1)                           # [1, R*f_out]
        rf = num_relation * f_out
        rel = jnp.arange(rf) // f_out
        mask = (rel[:, None] == rel[None, :]).astype(jnp.float32)  # [rf, rf]
        fused_layers.append((w, b, mask))

    w_head = jnp.concatenate([params["q_z_mean"][0], params["q_z_std_w"]], axis=1)
    b_mean = params["q_z_mean"][1]
    return {"layers": fused_layers, "w_head": w_head, "b_mean": b_mean}


# ----------------------------------------------------------------------------
# Pure-JAX reference (mirrors the PyTorch forward) for a correctness check
# ----------------------------------------------------------------------------
def reference_forward(params, adj, x, eps):
    def normalize(h):
        nrm = jnp.sqrt(jnp.sum(h * h, axis=1, keepdims=True))
        return h / jnp.maximum(nrm, 1e-12) * 1.8

    zs = []
    for layer_params in params["gcns"]:
        h = x
        for (w, b) in layer_params:
            h = jnp.tanh(adj @ normalize(h @ w + b))
        zs.append(h)
    zc = jnp.concatenate(zs, axis=1)
    wm, bm = params["q_z_mean"]
    mean = adj @ normalize(zc @ wm + bm)
    std = jnp.maximum(adj @ (zc @ params["q_z_std_w"]), 0.0) + 1e-4
    z = eps * std + mean
    return z, mean, std


# ----------------------------------------------------------------------------
if __name__ == "__main__":
    N = 8                 # number of graph nodes
    IN_FEATURE = 16
    NUM_RELATION = 2
    LATENT_DIM = 8
    LAYERS = [16, 16]

    key = jax.random.PRNGKey(0)
    kx, kadj, keps, kparams = jax.random.split(key, 4)

    x = jax.random.normal(kx, (N, IN_FEATURE), jnp.float32)
    # symmetric, row-normalized-ish adjacency with self loops
    a = jax.random.uniform(kadj, (N, N), jnp.float32)
    adj = (a + a.T) * 0.5 + jnp.eye(N, dtype=jnp.float32)
    adj = adj / jnp.sum(adj, axis=1, keepdims=True)

    eps = jax.random.normal(keps, (N, LATENT_DIM), jnp.float32)

    params = init_params(kparams, IN_FEATURE, NUM_RELATION, LATENT_DIM, LAYERS)
    fused = prepare_fused_params(params, NUM_RELATION, IN_FEATURE, LAYERS)

    z, m_q_z, std_q_z = mixture_of_ngcns_forward(fused, adj, x, eps)
    jax.block_until_ready((z, m_q_z, std_q_z))

    # correctness check against pure-JAX reference
    z_ref, m_ref, s_ref = reference_forward(params, adj, x, eps)
    assert z.shape == (N, LATENT_DIM)
    assert m_q_z.shape == (N, LATENT_DIM)
    assert std_q_z.shape == (N, LATENT_DIM)
    assert jnp.allclose(m_q_z, m_ref, rtol=1e-4, atol=1e-4)
    assert jnp.allclose(std_q_z, s_ref, rtol=1e-4, atol=1e-4)
    assert jnp.allclose(z, z_ref, rtol=1e-4, atol=1e-4)

    print("KERNEL_OK")
</pallas_src>

<mosaic_0001>
module attributes {stable_mosaic.version = 11 : i64} {
  func.func @_fused_forward_kernel(%arg0: memref<8x8xf32, #tpu.memory_space<vmem>>, %arg1: memref<8x16xf32, #tpu.memory_space<vmem>>, %arg2: memref<16x32xf32, #tpu.memory_space<vmem>>, %arg3: memref<1x32xf32, #tpu.memory_space<vmem>>, %arg4: memref<32x32xf32, #tpu.memory_space<vmem>>, %arg5: memref<32x32xf32, #tpu.memory_space<vmem>>, %arg6: memref<1x32xf32, #tpu.memory_space<vmem>>, %arg7: memref<32x32xf32, #tpu.memory_space<vmem>>, %arg8: memref<32x16xf32, #tpu.memory_space<vmem>>, %arg9: memref<1x8xf32, #tpu.memory_space<vmem>>, %arg10: memref<8x8xf32, #tpu.memory_space<vmem>>, %arg11: memref<8x8xf32, #tpu.memory_space<vmem>>, %arg12: memref<8x8xf32, #tpu.memory_space<vmem>>, %arg13: memref<8x8xf32, #tpu.memory_space<vmem>>) attributes {dimension_semantics = [], scalar_prefetch = 0 : i64, scratch_operands = 0 : i64, tpu.core_type = #tpu.core_type<tc>} {
    %c0 = arith.constant 0 : index
    %c0_0 = arith.constant 0 : index
    %0 = vector.load %arg0[%c0, %c0_0] : memref<8x8xf32, #tpu.memory_space<vmem>>, vector<8x8xf32>
    %c0_1 = arith.constant 0 : index
    %c0_2 = arith.constant 0 : index
    %1 = vector.load %arg1[%c0_1, %c0_2] : memref<8x16xf32, #tpu.memory_space<vmem>>, vector<8x16xf32>
    %c0_3 = arith.constant 0 : index
    %c0_4 = arith.constant 0 : index
    %2 = vector.load %arg2[%c0_3, %c0_4] : memref<16x32xf32, #tpu.memory_space<vmem>>, vector<16x32xf32>
    %cst = arith.constant dense<0.000000e+00> : vector<8x32xf32>
    %3 = tpu.matmul %1, %2, %cst {dimension_numbers = #tpu.dot_dimension_numbers<[1], [0], [0], [1], [0, 0, 1, 1], [], []>} : vector<8x16xf32>, vector<16x32xf32>, vector<8x32xf32> -> vector<8x32xf32>
    %c0_5 = arith.constant 0 : index
    %c0_6 = arith.constant 0 : index
    %4 = vector.load %arg3[%c0_5, %c0_6] : memref<1x32xf32, #tpu.memory_space<vmem>>, vector<1x32xf32>
    %5 = vector.broadcast %4 : vector<1x32xf32> to vector<8x32xf32>
    %6 = arith.addf %3, %5 : vector<8x32xf32>
    %7 = arith.mulf %6, %6 : vector<8x32xf32>
    %c0_7 = arith.constant 0 : index
    %c0_8 = arith.constant 0 : index
    %8 = vector.load %arg4[%c0_7, %c0_8] : memref<32x32xf32, #tpu.memory_space<vmem>>, vector<32x32xf32>
    %cst_9 = arith.constant dense<0.000000e+00> : vector<8x32xf32>
    %9 = tpu.matmul %7, %8, %cst_9 {dimension_numbers = #tpu.dot_dimension_numbers<[1], [0], [0], [1], [0, 0, 1, 1], [], []>} : vector<8x32xf32>, vector<32x32xf32>, vector<8x32xf32> -> vector<8x32xf32>
    %cst_10 = arith.constant 1.000000e-24 : f32
    %10 = vector.broadcast %cst_10 : f32 to vector<8x32xf32>
    %11 = arith.maximumf %9, %10 : vector<8x32xf32>
    %12 = math.rsqrt %11 : vector<8x32xf32>
    %cst_11 = arith.constant 1.800000e+00 : f32
    %13 = vector.broadcast %cst_11 : f32 to vector<8x32xf32>
    %14 = arith.mulf %12, %13 : vector<8x32xf32>
    %15 = arith.mulf %6, %14 : vector<8x32xf32>
    %cst_12 = arith.constant dense<0.000000e+00> : vector<8x32xf32>
    %16 = tpu.matmul %0, %15, %cst_12 {dimension_numbers = #tpu.dot_dimension_numbers<[1], [0], [0], [1], [0, 0, 1, 1], [], []>} : vector<8x8xf32>, vector<8x32xf32>, vector<8x32xf32> -> vector<8x32xf32>
    %17 = math.tanh %16 : vector<8x32xf32>
    %c0_13 = arith.constant 0 : index
    %c0_14 = arith.constant 0 : index
    %18 = vector.load %arg5[%c0_13, %c0_14] : memref<32x32xf32, #tpu.memory_space<vmem>>, vector<32x32xf32>
    %cst_15 = arith.constant dense<0.000000e+00> : vector<8x32xf32>
    %19 = tpu.matmul %17, %18, %cst_15 {dimension_numbers = #tpu.dot_dimension_numbers<[1], [0], [0], [1], [0, 0, 1, 1], [], []>} : vector<8x32xf32>, vector<32x32xf32>, vector<8x32xf32> -> vector<8x32xf32>
    %c0_16 = arith.constant 0 : index
    %c0_17 = arith.constant 0 : index
    %20 = vector.load %arg6[%c0_16, %c0_17] : memref<1x32xf32, #tpu.memory_space<vmem>>, vector<1x32xf32>
    %21 = vector.broadcast %20 : vector<1x32xf32> to vector<8x32xf32>
    %22 = arith.addf %19, %21 : vector<8x32xf32>
    %23 = arith.mulf %22, %22 : vector<8x32xf32>
    %c0_18 = arith.constant 0 : index
    %c0_19 = arith.constant 0 : index
    %24 = vector.load %arg7[%c0_18, %c0_19] : memref<32x32xf32, #tpu.memory_space<vmem>>, vector<32x32xf32>
    %cst_20 = arith.constant dense<0.000000e+00> : vector<8x32xf32>
    %25 = tpu.matmul %23, %24, %cst_20 {dimension_numbers = #tpu.dot_dimension_numbers<[1], [0], [0], [1], [0, 0, 1, 1], [], []>} : vector<8x32xf32>, vector<32x32xf32>, vector<8x32xf32> -> vector<8x32xf32>
    %cst_21 = arith.constant 1.000000e-24 : f32
    %26 = vector.broadcast %cst_21 : f32 to vector<8x32xf32>
    %27 = arith.maximumf %25, %26 : vector<8x32xf32>
    %28 = math.rsqrt %27 : vector<8x32xf32>
    %cst_22 = arith.constant 1.800000e+00 : f32
    %29 = vector.broadcast %cst_22 : f32 to vector<8x32xf32>
    %30 = arith.mulf %28, %29 : vector<8x32xf32>
    %31 = arith.mulf %22, %30 : vector<8x32xf32>
    %cst_23 = arith.constant dense<0.000000e+00> : vector<8x32xf32>
    %32 = tpu.matmul %0, %31, %cst_23 {dimension_numbers = #tpu.dot_dimension_numbers<[1], [0], [0], [1], [0, 0, 1, 1], [], []>} : vector<8x8xf32>, vector<8x32xf32>, vector<8x32xf32> -> vector<8x32xf32>
    %33 = math.tanh %32 : vector<8x32xf32>
    %c0_24 = arith.constant 0 : index
    %c0_25 = arith.constant 0 : index
    %34 = vector.load %arg8[%c0_24, %c0_25] : memref<32x16xf32, #tpu.memory_space<vmem>>, vector<32x16xf32>
    %cst_26 = arith.constant dense<0.000000e+00> : vector<8x16xf32>
    %35 = tpu.matmul %33, %34, %cst_26 {dimension_numbers = #tpu.dot_dimension_numbers<[1], [0], [0], [1], [0, 0, 1, 1], [], []>} : vector<8x32xf32>, vector<32x16xf32>, vector<8x16xf32> -> vector<8x16xf32>
    %36 = vector.extract_strided_slice %35 {offsets = [0, 0], sizes = [8, 8], strides = [1, 1]} : vector<8x16xf32> to vector<8x8xf32>
    %c0_27 = arith.constant 0 : index
    %c0_28 = arith.constant 0 : index
    %37 = vector.load %arg9[%c0_27, %c0_28] : memref<1x8xf32, #tpu.memory_space<vmem>>, vector<1x8xf32>
    %38 = vector.broadcast %37 : vector<1x8xf32> to vector<8x8xf32>
    %39 = arith.addf %36, %38 : vector<8x8xf32>
    %40 = arith.mulf %39, %39 : vector<8x8xf32>
    %cst_29 = arith.constant dense<0.000000e+00> : vector<8xf32>
    %41 = vector.multi_reduction <add>, %40, %cst_29 [1] : vector<8x8xf32> to vector<8xf32>
    %42 = vector.shape_cast %41 : vector<8xf32> to vector<8x1xf32>
    %cst_30 = arith.constant 1.000000e-24 : f32
    %43 = vector.broadcast %cst_30 : f32 to vector<8x1xf32>
    %44 = arith.maximumf %42, %43 : vector<8x1xf32>
    %45 = math.rsqrt %44 : vector<8x1xf32>
    %cst_31 = arith.constant 1.800000e+00 : f32
    %46 = vector.broadcast %cst_31 : f32 to vector<8x1xf32>
    %47 = arith.mulf %45, %46 : vector<8x1xf32>
    %48 = vector.broadcast %47 : vector<8x1xf32> to vector<8x8xf32>
    %49 = arith.mulf %39, %48 : vector<8x8xf32>
    %50 = vector.extract_strided_slice %35 {offsets = [0, 8], sizes = [8, 8], strides = [1, 1]} : vector<8x16xf32> to vector<8x8xf32>
    %cst_32 = arith.constant dense<0.000000e+00> : vector<8x8xf32>
    %51 = tpu.matmul %0, %49, %cst_32 {dimension_numbers = #tpu.dot_dimension_numbers<[1], [0], [0], [1], [0, 0, 1, 1], [], []>} : vector<8x8xf32>, vector<8x8xf32>, vector<8x8xf32> -> vector<8x8xf32>
    %cst_33 = arith.constant dense<0.000000e+00> : vector<8x8xf32>
    %52 = tpu.matmul %0, %50, %cst_33 {dimension_numbers = #tpu.dot_dimension_numbers<[1], [0], [0], [1], [0, 0, 1, 1], [], []>} : vector<8x8xf32>, vector<8x8xf32>, vector<8x8xf32> -> vector<8x8xf32>
    %cst_34 = arith.constant 0.000000e+00 : f32
    %53 = vector.broadcast %cst_34 : f32 to vector<8x8xf32>
    %54 = arith.maximumf %52, %53 : vector<8x8xf32>
    %cst_35 = arith.constant 9.99999974E-5 : f32
    %55 = vector.broadcast %cst_35 : f32 to vector<8x8xf32>
    %56 = arith.addf %54, %55 : vector<8x8xf32>
    %c0_36 = arith.constant 0 : index
    %c0_37 = arith.constant 0 : index
    %57 = vector.load %arg12[%c0_36, %c0_37] : memref<8x8xf32, #tpu.memory_space<vmem>>, vector<8x8xf32>
    tpu.vector_store %arg12[%c0_36, %c0_37], %51 {strides = array<i32>} : memref<8x8xf32, #tpu.memory_space<vmem>>, vector<8x8xf32>,
    %c0_38 = arith.constant 0 : index
    %c0_39 = arith.constant 0 : index
    %58 = vector.load %arg13[%c0_38, %c0_39] : memref<8x8xf32, #tpu.memory_space<vmem>>, vector<8x8xf32>
    tpu.vector_store %arg13[%c0_38, %c0_39], %56 {strides = array<i32>} : memref<8x8xf32, #tpu.memory_space<vmem>>, vector<8x8xf32>,
    %c0_40 = arith.constant 0 : index
    %c0_41 = arith.constant 0 : index
    %59 = vector.load %arg10[%c0_40, %c0_41] : memref<8x8xf32, #tpu.memory_space<vmem>>, vector<8x8xf32>
    %60 = arith.mulf %59, %56 : vector<8x8xf32>
    %61 = arith.addf %60, %51 : vector<8x8xf32>
    %c0_42 = arith.constant 0 : index
    %c0_43 = arith.constant 0 : index
    %62 = vector.load %arg11[%c0_42, %c0_43] : memref<8x8xf32, #tpu.memory_space<vmem>>, vector<8x8xf32>
    tpu.vector_store %arg11[%c0_42, %c0_43], %61 {strides = array<i32>} : memref<8x8xf32, #tpu.memory_space<vmem>>, vector<8x8xf32>,
    return
  }
}

</mosaic_0001>

<bundles_post_ra>
// kernel: tpu_custom_call.1
= control target key start
LH: loop header
LB: loop body
LE: loop exit
PB: predicated region body
PF: predicated region fallthrough
CT: control target
= control target key end

     0   :  { %19 = vsyncpa [#allocation3], 0  ;;  %s1455_s0 = inlined_call_operand.hbm [shape: f32[8,8], index: 0, kind: input, shape index: {}]   ;;  %s1456_s1 = inlined_call_operand.hbm [shape: f32[8,16], index: 1, kind: input, shape index: {}]   ;;  %s1457_s2 = inlined_call_operand.hbm [shape: f32[16,32], index: 2, kind: input, shape index: {}]   ;;  %s1458_s3 = inlined_call_operand.vmem [shape: f32[1,32], index: 3, kind: input, shape index: {}]   ;;  %s1459_s4 = inlined_call_operand.vmem [shape: f32[32,32], index: 4, kind: input, shape index: {}]   ;;  %s1460_s5 = inlined_call_operand.vmem [shape: f32[32,32], index: 5, kind: input, shape index: {}]   ;;  %s1461_s6 = inlined_call_operand.vmem [shape: f32[1,32], index: 6, kind: input, shape index: {}]   ;;  %s1462_s7 = inlined_call_operand.hbm [shape: f32[32,32], index: 7, kind: input, shape index: {}]   ;;  %s1463_s8 = inlined_call_operand.vmem [shape: f32[32,16], index: 8, kind: input, shape index: {}]   ;;  %s1464_s9 = inlined_call_operand.vmem [shape: f32[1,8], index: 9, kind: input, shape index: {}]   ;;  %s1465_s10 = inlined_call_operand.vmem [shape: f32[8,8], index: 10, kind: input, shape index: {}]   ;;  %s1466_s11 = inlined_call_operand.hbm [shape: f32[8,8], index: 11, kind: output, shape index: {0}]   ;;  %s1467_s12 = inlined_call_operand.hbm [shape: f32[8,8], index: 12, kind: output, shape index: {1}]   ;;  %s1468_s13 = inlined_call_operand.hbm [shape: f32[8,8], index: 13, kind: output, shape index: {2}]  }
   0x1   :  { %20 = vsyncpa [#allocation6], 0 }
   0x2   :  { %21 = vsyncpa [#allocation9], 0 }
   0x3   :  { %22 = vsyncpa [#allocation4], 0 }
   0x4   :  { %23 = vsyncpa [#allocation12], 0  ;;  %s1191_s25 = smov [#allocation5]   ;;  %s1192_s27 = smov [#allocation2]  }
   0x5   :  { %s40_s26 = sshll.u32 %s1191_s25, 4  ;;  %s30_s28 = sshll.u32 %s1192_s27, 4  ;;  %s41_s26 = int_to_ptr.vmem [resolvable:$true] %s40_s26  ;;  %s31_s28 = int_to_ptr.vmem [resolvable:$true] %s30_s28 }
   0x6   :  { %s1027_s14 = scalar_lea.hbm %s1456_s1, 128 }
   0x7   :  { %p1028_p0 = scmp.ne.s32.totalorder %s1456_s1, %s1027_s14  ;;  %p1031_p1 = scmp.lt.u32.totalorder %s1027_s14, %s1456_s1 }
   0x9   :  { %p1033_p2 = pnand %p1031_p1, %p1028_p0 }
   0xb   :  { %1036 = shalt.err (!%p1033_p2)
}
   0xc   :  { %s1037_s19 = scalar_lea.vmem %s41_s26, 128  ;;  %p1042_p4 = scmp.lt.s32.totalorder %s41_s26, %s41_s26 }
   0xd   :  { %p1038_p3 = scmp.ne.s32.totalorder %s41_s26, %s1037_s19  ;;  %p1043_p5 = scmp.lt.s32.totalorder %s1037_s19, %s1037_s19 }
   0xf   :  { %p1044_p6 = por %p1043_p5, %p1042_p4 }
  0x11   :  { %p1045_p7 = pnand %p1044_p6, %p1038_p3 }
  0x13   :  { %1048 = shalt.err (!%p1045_p7)
}
  0x14   :  { %43 = dma.hbm_to_vmem [thread:$0]  %s1456_s1, 128, %s41_s26, [#allocation6]  }
  0x15   :  { %s1049_s24 = scalar_lea.hbm %s1455_s0, 128 }
  0x16   :  { %p1050_p8 = scmp.ne.s32.totalorder %s1455_s0, %s1049_s24  ;;  %p1053_p9 = scmp.lt.u32.totalorder %s1049_s24, %s1455_s0 }
  0x18   :  { %p1055_p10 = pnand %p1053_p9, %p1050_p8 }
  0x1a   :  { %1058 = shalt.err (!%p1055_p10)
}
  0x1b   :  { %s1059_s14 = scalar_lea.vmem %s31_s28, 128  ;;  %p1064_p12 = scmp.lt.s32.totalorder %s31_s28, %s31_s28 }
  0x1c   :  { %p1060_p11 = scmp.ne.s32.totalorder %s31_s28, %s1059_s14  ;;  %p1065_p13 = scmp.lt.s32.totalorder %s1059_s14, %s1059_s14 }
  0x1e   :  { %p1066_p0 = por %p1065_p13, %p1064_p12 }
  0x20   :  { %p1067_p1 = pnand %p1066_p0, %p1060_p11 }
  0x22   :  { %1070 = shalt.err (!%p1067_p1)
}
  0x23   :  { %33 = dma.hbm_to_vmem [thread:$0]  %s1455_s0, 128, %s31_s28, [#allocation3]  }
  0x24   :  { %s1193_s15 = smov [#allocation7]   ;;  %s1071_s19 = scalar_lea.hbm %s1457_s2, 256 }
  0x25   :  { %s49_s16 = sshll.u32 %s1193_s15, 4  ;;  %p1072_p2 = scmp.ne.s32.totalorder %s1457_s2, %s1071_s19  ;;  %s50_s16 = int_to_ptr.vmem [resolvable:$true] %s49_s16 }
  0x26   :  { %p1075_p3 = scmp.lt.u32.totalorder %s1071_s19, %s1457_s2 }
  0x28   :  { %p1077_p4 = pnand %p1075_p3, %p1072_p2 }
  0x2a   :  { %1080 = shalt.err (!%p1077_p4)
}
  0x2b   :  { %s1081_s24 = scalar_lea.vmem %s50_s16, 256  ;;  %p1086_p6 = scmp.lt.s32.totalorder %s50_s16, %s50_s16 }
  0x2c   :  { %p1082_p5 = scmp.ne.s32.totalorder %s50_s16, %s1081_s24  ;;  %p1087_p7 = scmp.lt.s32.totalorder %s1081_s24, %s1081_s24 }
  0x2e   :  { %p1088_p8 = por %p1087_p7, %p1086_p6 }
  0x30   :  { %p1089_p9 = pnand %p1088_p8, %p1082_p5 }
  0x32   :  { %1092 = shalt.err (!%p1089_p9)
}
  0x33   :  { %s1194_s0 = smov 128   ;;  %s1195_s28 = smov 8  }
  0x34   :  { %55 = dma.hbm_to_vmem [thread:$0]  %s1457_s2, 256, %s50_s16, [#allocation6], %s1194_s0, %s1194_s0, %s1195_s28  }
  0x35   :  { %s1196_s29 = smov [#allocation8]   ;;  %s1093_s26 = scalar_lea.hbm %s1462_s7, 512 }
  0x36   :  { %s69_s30 = sshll.u32 %s1196_s29, 4  ;;  %p1094_p10 = scmp.ne.s32.totalorder %s1462_s7, %s1093_s26  ;;  %s70_s30 = int_to_ptr.vmem [resolvable:$true] %s69_s30 }
  0x37   :  { %p1097_p11 = scmp.lt.u32.totalorder %s1093_s26, %s1462_s7 }
  0x39   :  { %p1099_p12 = pnand %p1097_p11, %p1094_p10 }
  0x3b   :  { %1102 = shalt.err (!%p1099_p12)
}
  0x3c   :  { %s1103_s20 = scalar_lea.vmem %s70_s30, 512  ;;  %p1108_p0 = scmp.lt.s32.totalorder %s70_s30, %s70_s30 }
  0x3d   :  { %p1104_p13 = scmp.ne.s32.totalorder %s70_s30, %s1103_s20  ;;  %p1109_p1 = scmp.lt.s32.totalorder %s1103_s20, %s1103_s20 }
  0x3f   :  { %p1110_p2 = por %p1109_p1, %p1108_p0 }
  0x41   :  { %p1111_p3 = pnand %p1110_p2, %p1104_p13 }
  0x43   :  { %1114 = shalt.err (!%p1111_p3)
}
  0x44   :  { %75 = dma.hbm_to_vmem [thread:$0]  %s1462_s7, 512, %s70_s30, [#allocation9], %s1194_s0, %s1194_s0, %s1195_s28  }
  0x45   :  { %1181 = dma.done.wait [#allocation3], 128  }
  0x46   :  { %1182 = vsyncadd [#allocation3], 4294967168 }
  0x47   :  { %1183 = dma.done.wait [#allocation6], 384  }
  0x48   :  { %1184 = vsyncadd [#allocation6], 4294966912 }
  0x49   :  { %1185 = dma.done.wait [#allocation9], 512  }
  0x4a   :  { %1186 = vsyncadd [#allocation9], 4294966784  ;;  %v1197_v0 = vmov 0.0|0.0   ;;  %vm1198_vm0 = vmmov 0   ;;  %v1199_v1 = vmov 0.0   ;;  %v96_v2 = vld [vmem:[#allocation7] sm:$0xff] }
  0x4b   :  { %977 = vmatprep.subr.bf16.mxu0 %v1197_v0  ;;  %910 = vmatprep.mubr.msk.f32.mxu0 %vm1198_vm0, %v1199_v1  ;;  %v97_v3 = vld [vmem:[#allocation7 + $0x8] sm:$0xff]  ;;  %v180_v5 = vld [vmem:[%s1459_s4] sm:$0xff]  ;;  %v181_v6 = vld [vmem:[%s1459_s4 + $0x8] sm:$0xff]  ;;  %vm105_vm1 = vcmask 130048   ;;  %vm184_vm2 = vcmask 261120   ;;  %vm262_vm3 = vcmask 64512  }
  0x4c   :  { %980 = vmatprep.subr.bf16.mxu1 %v1197_v0  ;;  %921 = vmatprep.mubr.msk.f32.mxu1 %vm1198_vm0, %v1199_v1  ;;  %v978_v4 = vpack.c.bf16 %v97_v3, %v96_v2  ;;  %v981_v7 = vpack.c.bf16 %v181_v6, %v180_v5  ;;  %v95_v8 = vld [vmem:[#allocation5] sm:$0xff]  ;;  %v182_v9 = vld [vmem:[%s1459_s4 + $0x10] sm:$0xff]  ;;  %v183_v10 = vld [vmem:[%s1459_s4 + $0x18] sm:$0xff] }
  0x4d   :  { %v984_v11 = vpack.c.bf16 %v183_v10, %v182_v9  ;;  %v863_v12 = vld [vmem:[%s1458_s3] ss:$0 sm:$0xff]  ;;  %v338_v25 = vld [vmem:[%s1460_s5 + $0x8] sm:$0xff]  ;;  %v339_v26 = vld [vmem:[%s1460_s5 + $0x10] sm:$0xff] }
  0x4e   :  { %979 = vmatpush3.bf16.msra.mxu0 %v978_v4  ;;  %982 = vmatpush3.bf16.msra.mxu1 %v981_v7  ;;  %v1351_v23 = vld [vmem:[#allocation2] sm:$0xff]  ;;  %v340_v28 = vld [vmem:[%s1460_s5 + $0x18] sm:$0xff]  ;;  %v423_v31 = vld [vmem:[#allocation8 + $0x8] sm:$0xff] }
  0x4f   :  { %924 = vmatprep.subr.mxu0 %v1199_v1  ;;  %983 = vmatprep.subr.bf16.mxu1 %v1197_v0  ;;  %v337_v24 = vld [vmem:[%s1460_s5] sm:$0xff]  ;;  %v990_v29 = vpack.c.bf16 %v340_v28, %v339_v26  ;;  %v424_v36 = vld [vmem:[#allocation8 + $0x10] sm:$0xff]  ;;  %v425_v37 = vld [vmem:[#allocation8 + $0x18] sm:$0xff] }
  0x50   :  { %v987_v27 = vpack.c.bf16 %v338_v25, %v337_v24  ;;  %v422_v30 = vld [vmem:[#allocation8] sm:$0xff]  ;;  %v996_v38 = vpack.c.bf16 %v425_v37, %v424_v36  ;;  %v575_v51 = vld [vmem:[%s1463_s8 + $0x8] sm:$0xff]  ;;  %v576_v52 = vld [vmem:[%s1463_s8 + $0x10] sm:$0xff] }
  0x51   :  { %911 = vmatmul.mubr.msk.f32.vlgmr.msra.gmra.mrb[0].mxu0 %vm105_vm1, %v95_v8  ;;  %v993_v32 = vpack.c.bf16 %v423_v31, %v422_v30  ;;  %v867_v39 = vld [vmem:[%s1461_s6] ss:$0 sm:$0xff]  ;;  %v577_v54 = vld [vmem:[%s1463_s8 + $0x18] sm:$0xff] }
  0x52   :  { %926 = vmatprep.mubr.msk.f32.mxu0 %vm1198_vm0, %v1199_v1  ;;  %985 = vmatpush3.bf16.msra.mxu1 %v984_v11  ;;  %v574_v50 = vld [vmem:[%s1463_s8] sm:$0xff]  ;;  %v1002_v55 = vpack.c.bf16 %v577_v54, %v576_v52  ;;  %s1200_s8 = smov 120  }
  0x53   :  { %992 = vmatprep.subr.bf16.mxu1 %v1197_v0  ;;  %v999_v53 = vpack.c.bf16 %v575_v51, %v574_v50  ;;  %v872_v59 = vld [vmem:[%s1464_s9] ss:$0 sm:$0xff]  ;;  %s1201_s9 = smov [#allocation11]  }
  0x54   :  { %s835_s0 = sshll.u32 %s1201_s9, 4  ;;  %s836_s0 = int_to_ptr.vmem [resolvable:$true] %s835_s0 }
  0x55   :  { %s1115_s28 = scalar_lea.vmem %s836_s0, 128  ;;  %p1120_p5 = scmp.lt.s32.totalorder %s836_s0, %s836_s0 }
  0x56   :  { %p1116_p4 = scmp.ne.s32.totalorder %s836_s0, %s1115_s28  ;;  %p1121_p6 = scmp.lt.s32.totalorder %s1115_s28, %s1115_s28 }
  0x58   :  { %p1122_p7 = por %p1121_p6, %p1120_p5 }
  0x5a   :  { %p1123_p8 = pnand %p1122_p7, %p1116_p4 }
 0x124   :  { %v175_v13 = vpop.f32.mrb[0].mxu0 }
 0x125   :  { %v176_v14 = vadd.f32 %v863_v12, %v175_v13  ;;  %v912_v15 = vpop.f32.mrb[1].mxu0 }
 0x127   :  { %v179_v16 = vmul.f32 %v176_v14, %v176_v14 }
 0x129   :  { %922 = vmatmul.mubr.msk.f32.vlgmr.msra.gmra.mrb[0].mxu1 %vm184_vm2, %v179_v16 }
 0x12a   :  { %948 = vmatprep.mubr.msk.f32.mxu1 %vm1198_vm0, %v1199_v1  ;;  %994 = vmatpush3.bf16.msra.mxu1 %v993_v32 }
 0x12b   :  { %995 = vmatprep.subr.bf16.mxu1 %v1197_v0 }
 0x12e   :  { %997 = vmatpush3.bf16.msra.mxu1 %v996_v38 }
 0x12f   :  { %998 = vmatprep.subr.bf16.mxu1 %v1197_v0 }
 0x1fc   :  { %v254_v17 = vpop.f32.mrb[0].mxu1 }
 0x1fd   :  { %v258_v18 = vmax.f32 %v254_v17, 1e-24  ;;  %v923_v19 = vpop.f32.mrb[1].mxu1 }
 0x1ff   :  { %1017 = vrsqrt.f32 %v258_v18 }
 0x209   :  { %v1018_v20 = vpop.eup %1017 }
 0x20a   :  { %v260_v21 = vmul.f32 1.8, %v1018_v20 }
 0x20c   :  { %v261_v22 = vmul.f32 %v260_v21, %v176_v14 }
 0x20e   :  { %925 = vmatpush3.msra.mxu0 %v261_v22 }
 0x20f   :  { %927 = vmatmul.mubr.msk.f32.vlgmr.msra.gmra.mrb[2].mxu0 %vm262_vm3, %v1351_v23  ;;  %986 = vmatprep.subr.bf16.mxu0 %v1197_v0 }
 0x210   :  { %937 = vmatprep.mubr.msk.f32.mxu0 %vm1198_vm0, %v1199_v1  ;;  %988 = vmatpush3.bf16.msra.mxu0 %v987_v27 }
 0x211   :  { %989 = vmatprep.subr.bf16.mxu0 %v1197_v0 }
 0x214   :  { %991 = vmatpush3.bf16.msra.mxu0 %v990_v29 }
 0x215   :  { %951 = vmatprep.subr.mxu0 %v1199_v1 }
 0x2e2   :  { %v332_v33 = vpop.f32.mrb[2].mxu0 }
 0x2e3   :  { %1019 = vtanh.f32 %v332_v33  ;;  %v928_v34 = vpop.f32.mrb[3].mxu0 }
 0x2ed   :  { %v1020_v35 = vpop.eup %1019 }
 0x2ee   :  { %938 = vmatmul.mubr.msk.f32.vlgmr.msra.gmra.mrb[4].mxu0 %vm184_vm2, %v1020_v35 }
 0x2ef   :  { %953 = vmatprep.mubr.msk.f32.mxu0 %vm1198_vm0, %v1199_v1 }
 0x3c1   :  { %v417_v40 = vpop.f32.mrb[4].mxu0 }
 0x3c2   :  { %v418_v41 = vadd.f32 %v867_v39, %v417_v40  ;;  %v939_v42 = vpop.f32.mrb[5].mxu0 }
 0x3c4   :  { %v421_v43 = vmul.f32 %v418_v41, %v418_v41 }
 0x3c6   :  { %949 = vmatmul.mubr.msk.f32.vlgmr.msra.gmra.mrb[2].mxu1 %vm184_vm2, %v421_v43 }
 0x3c7   :  { %964 = vmatprep.mubr.msk.f32.mxu1 %vm1198_vm0, %v1199_v1  ;;  %1000 = vmatpush3.bf16.msra.mxu1 %v999_v53 }
 0x3c8   :  { %1001 = vmatprep.subr.bf16.mxu1 %v1197_v0 }
 0x3cb   :  { %1003 = vmatpush3.bf16.msra.mxu1 %v1002_v55 }
 0x499   :  { %v495_v44 = vpop.f32.mrb[2].mxu1 }
 0x49a   :  { %v499_v45 = vmax.f32 %v495_v44, 1e-24  ;;  %v950_v46 = vpop.f32.mrb[3].mxu1 }
 0x49c   :  { %1021 = vrsqrt.f32 %v499_v45 }
 0x4a6   :  { %v1022_v47 = vpop.eup %1021 }
 0x4a7   :  { %v501_v48 = vmul.f32 1.8, %v1022_v47 }
 0x4a9   :  { %v502_v49 = vmul.f32 %v501_v48, %v418_v41 }
 0x4ab   :  { %952 = vmatpush3.msra.mxu0 %v502_v49 }
 0x4ac   :  { %954 = vmatmul.mubr.msk.f32.vlgmr.msra.gmra.mrb[6].mxu0 %vm262_vm3, %v1351_v23  ;;  %967 = vmatprep.subr.mxu0 %v1199_v1 }
 0x4ad   :  { %969 = vmatprep.mubr.msk.f32.mxu0 %vm1198_vm0, %v1199_v1 }
 0x57f   :  { %v569_v56 = vpop.f32.mrb[6].mxu0 }
 0x580   :  { %1023 = vtanh.f32 %v569_v56  ;;  %v955_v57 = vpop.f32.mrb[7].mxu0 }
 0x58a   :  { %v1024_v58 = vpop.eup %1023 }
 0x58b   :  { %965 = vmatmul.mubr.msk.f32.vlgmr.msra.gmra.mrb[4].mxu1 %vm184_vm2, %v1024_v58 }
 0x65e   :  { %v647_v60 = vpop.f32.mrb[4].mxu1 }
 0x65f   :  { %v658_v61 = vadd.f32 %v872_v59, %v647_v60  ;;  %v966_v62 = vpop.f32.mrb[5].mxu1 }
 0x661   :  { %v659_v63 = vmul.f32 %v658_v61, %v658_v61 }
 0x663   :  { %v660_v2 = vsel %vm262_vm3, %v659_v63, 0.0 }
 0x664   :  { %661 = vadd.xlane.f32.xlu0 %v660_v2 }
 0x67a   :  { %738 = vrot.lane.b32.xlu0 %v647_v60, %s1200_s8 }
 0x6f1   :  { %v662_v0 = vpop.xlane.xlu0 %661 }
 0x6f2   :  { %v663_v3 = vmax.f32 %v662_v0, 1e-24 }
 0x6f4   :  { %1025 = vrsqrt.f32 %v663_v3 }
 0x6f5   :  { %v739_v7 = vpop.permute.xlu0 %738 }
 0x6fe   :  { %v1026_v4 = vpop.eup %1025 }
 0x6ff   :  { %v665_v5 = vmul.f32 1.8, %v1026_v4 }
 0x701   :  { %v666_v6 = vmul.f32 %v665_v5, %v658_v61 }
 0x703   :  { %968 = vmatpush3.msra.mxu0 %v666_v6 }
 0x704   :  { %970 = vmatmul.mubr.msk.f32.vlgmr.msra.gmra.mrb[8].mxu0 %vm262_vm3, %v1351_v23  ;;  %972 = vmatprep.subr.mxu0 %v1199_v1 }
 0x705   :  { %973 = vmatpush3.msra.mxu0 %v739_v7  ;;  %974 = vmatprep.mubr.msk.f32.mxu0 %vm1198_vm0, %v1199_v1 }
 0x708   :  { %975 = vmatmul.mubr.msk.f32.vlgmr.msra.gmra.mrb[10].mxu0 %vm262_vm3, %v1351_v23 }
 0x7d7   :  { %v733_v8 = vpop.f32.mrb[8].mxu0 }
 0x7d8   :  { %813 = vst.msk [vmem:[#allocation11] sm:$0xff] %vm262_vm3, %v733_v8  ;;  %v971_v9 = vpop.f32.mrb[9].mxu0 }
 0x7d9   :  { %1126 = shalt.err (!%p1123_p8)
}
 0x7da   :  { %s1127_s29 = scalar_lea.hbm %s1467_s12, 128 }
 0x7db   :  { %p1128_p9 = scmp.ne.s32.totalorder %s1467_s12, %s1127_s29  ;;  %p1131_p10 = scmp.lt.u32.totalorder %s1127_s29, %s1467_s12 }
 0x7dd   :  { %p1133_p11 = pnand %p1131_p10, %p1128_p9 }
 0x7df   :  { %1136 = shalt.err (!%p1133_p11)
}
 0x7e0   :  { %838 = dma.vmem_to_hbm [thread:$0]  %s836_s0, 128, %s1467_s12, [#allocation12]   ;;  %v807_v1 = vpop.f32.mrb[10].mxu0  ;;  %v815_v12 = vld [vmem:[%s1465_s10] sm:$0xff] }
 0x7e1   :  { %s1202_s15 = smov [#allocation13]   ;;  %v811_v10 = vmax.f32 %v807_v1, 0.0  ;;  %v976_v11 = vpop.f32.mrb[11].mxu0  ;;  %s1203_s6 = smov [#allocation10]  }
 0x7e2   :  { %s845_s17 = sshll.u32 %s1202_s15, 4  ;;  %s825_s19 = sshll.u32 %s1203_s6, 4  ;;  %s846_s17 = int_to_ptr.vmem [resolvable:$true] %s845_s17  ;;  %s826_s19 = int_to_ptr.vmem [resolvable:$true] %s825_s19 }
 0x7e3   :  { %v812_v13 = vadd.f32 0.0001, %v811_v10  ;;  %s1137_s20 = scalar_lea.vmem %s846_s17, 128  ;;  %p1142_p13 = scmp.lt.s32.totalorder %s846_s17, %s846_s17 }
 0x7e4   :  { %p1138_p12 = scmp.ne.s32.totalorder %s846_s17, %s1137_s20  ;;  %p1143_p0 = scmp.lt.s32.totalorder %s1137_s20, %s1137_s20 }
 0x7e5   :  { %v816_v14 = vmul.f32 %v815_v12, %v812_v13  ;;  %814 = vst.msk [vmem:[#allocation13] sm:$0xff] %vm262_vm3, %v812_v13 }
 0x7e6   :  { %p1144_p1 = por %p1143_p0, %p1142_p13 }
 0x7e8   :  { %p1145_p2 = pnand %p1144_p1, %p1138_p12 }
 0x7ea   :  { %1148 = shalt.err (!%p1145_p2)
}
 0x7eb   :  { %s1149_s16 = scalar_lea.hbm %s1468_s13, 128 }
 0x7ec   :  { %p1150_p3 = scmp.ne.s32.totalorder %s1468_s13, %s1149_s16  ;;  %p1153_p4 = scmp.lt.u32.totalorder %s1149_s16, %s1468_s13 }
 0x7ee   :  { %p1155_p5 = pnand %p1153_p4, %p1150_p3 }
 0x7f0   :  { %1158 = shalt.err (!%p1155_p5)
}
 0x7f1   :  { %848 = dma.vmem_to_hbm [thread:$0]  %s846_s17, 128, %s1468_s13, [#allocation12]   ;;  %v817_v15 = vadd.f32 %v816_v14, %v733_v8 }
 0x7f2   :  { %s1159_s8 = scalar_lea.vmem %s826_s19, 128  ;;  %p1164_p7 = scmp.lt.s32.totalorder %s826_s19, %s826_s19 }
 0x7f3   :  { %818 = vst.msk [vmem:[#allocation10] sm:$0xff] %vm262_vm3, %v817_v15  ;;  %p1160_p6 = scmp.ne.s32.totalorder %s826_s19, %s1159_s8  ;;  %p1165_p8 = scmp.lt.s32.totalorder %s1159_s8, %s1159_s8 }
 0x7f5   :  { %p1166_p9 = por %p1165_p8, %p1164_p7 }
 0x7f7   :  { %p1167_p10 = pnand %p1166_p9, %p1160_p6 }
 0x7f9   :  { %1170 = shalt.err (!%p1167_p10)
}
 0x7fa   :  { %s1171_s28 = scalar_lea.hbm %s1466_s11, 128 }
 0x7fb   :  { %p1172_p11 = scmp.ne.s32.totalorder %s1466_s11, %s1171_s28  ;;  %p1175_p12 = scmp.lt.u32.totalorder %s1171_s28, %s1466_s11 }
 0x7fd   :  { %p1177_p13 = pnand %p1175_p12, %p1172_p11 }
 0x7ff   :  { %1180 = shalt.err (!%p1177_p13)
}
 0x800   :  { %828 = dma.vmem_to_hbm [thread:$0]  %s826_s19, 128, %s1466_s11, [#allocation4]  }
 0x801   :  { %1187 = dma.done.wait [#allocation4], 128  }
 0x802   :  { %1188 = vsyncadd [#allocation4], 4294967168 }
 0x803   :  { %1189 = dma.done.wait [#allocation12], 256  }
 0x804   :  { %1190 = vsyncadd [#allocation12], 4294967040 }
 0x805   :  { %858 = vsyncpa [#allocation3], 1 }
 0x806   :  { %859 = vsyncpa [#allocation6], 1 }
 0x807   :  { %860 = vsyncpa [#allocation9], 1 }
 0x808   :  { %861 = vsyncpa [#allocation4], 1 }
 0x809   :  { %862 = vsyncpa [#allocation12], 1 }

</bundles_post_ra>
